<compile_context>
chip_gen: v6e
topology: v6e:2x2x1
jax: 0.10.0
libtpu: 0.0.40
codegen_flags: <defaults>
</compile_context>

<pallas_src>
import functools

import jax
import jax.numpy as jnp
from jax.experimental import pallas as pl
from jax.experimental.pallas import tpu as pltpu


# ---------------------------------------------------------------------------
# Budgets / tiling plans
# ---------------------------------------------------------------------------
def _detect_vmem_limit():
    """Generation-aware scoped-VMEM budget (v7x: 64 MiB VMEM, v5e/v6e: 128 MiB)."""
    try:
        cap = int(pltpu.get_tpu_info().vmem_capacity_bytes)
    except Exception:  # API unavailable -> conservative default valid everywhere
        cap = 64 * 1024 * 1024
    return max(32 * 1024 * 1024, min(int(0.45 * cap), 64 * 1024 * 1024))


_VMEM_LIMIT = _detect_vmem_limit()
_TARGET_BLOCK_BYTES = 2 << 20   # ~2 MiB input blocks: ~85%+ of HBM roofline
_MAX_TILE_LANES = 4096          # keeps the static lane-chunk unroll <= 32 / row
_FUSED_MAX_M = 16384            # bounds the static unroll of the fused kernel


def _c_tile_candidates(c):
    """Channel tiles (descending); <=64 rows keeps f32 accumulators register-resident."""
    if c <= 64:
        return [c]
    if c % 8 == 0:
        cands = [t for t in range(64, 7, -8) if c % t == 0]
        if cands:
            return cands
    return [c]  # odd channel count > 64 (rare): keep full extent


def _chunk_plan(tile_m):
    """Lane chunking inside a block: 128-wide chunks plus an optional masked tail."""
    if tile_m <= 128:
        return tile_m, 1, 0
    return 128, tile_m // 128, tile_m % 128


def _plan_tiles(n, c, m, itemsize):
    """(nb, c_tile, tile_m) for the streaming (two-pass) kernels."""
    c_cands = _c_tile_candidates(c)
    c_tile = c_cands[0]
    if m < 128 or m % 128 != 0:
        tile_m = m                      # lane tiles must be 128-multiples or full extent
        for t in c_cands:               # shrink channel tile if forced full-M block is huge
            c_tile = t
            if t * tile_m * itemsize <= 3 * _TARGET_BLOCK_BYTES:
                break
    else:
        cap = min(_MAX_TILE_LANES,
                  max(128, _TARGET_BLOCK_BYTES // max(1, c_tile * itemsize)))
        cap = max(128, (cap // 128) * 128)
        if m <= cap:
            tile_m = m
        else:
            tile_m = 128
            for t in range(256, cap + 1, 128):
                if m % t == 0:
                    tile_m = t
    # Batch rows per block: grow small C*M blocks up to ~2x target so the
    # per-grid-step overhead amortizes; must divide N exactly.
    blk = c_tile * tile_m * itemsize
    nb = 1
    for t in range(1, n + 1):
        if n % t == 0 and t * blk <= 2 * _TARGET_BLOCK_BYTES:
            nb = t
    return nb, c_tile, tile_m


def _fused_c_tile(n, c, m, itemsize):
    """Largest channel tile for which the single-read fused path fits in VMEM."""
    if m > _FUSED_MAX_M:
        return None
    budget = int(0.8 * _VMEM_LIMIT)
    for t in _c_tile_candidates(c):
        need = 4 * n * t * m * itemsize + (1 << 20)  # x + y blocks, double-buffered
        if need <= budget:
            return t
    return None


# ---------------------------------------------------------------------------
# Kernels
# ---------------------------------------------------------------------------
def _make_stats_kernel(nb, n_full, chunk_w, tail, tile_m, init_axes):
    """Per-channel sum / sum-of-squares into a resident (c_tile, chunk_w) block."""

    def kernel(x_ref, sum_ref, sq_ref):
        first = pl.program_id(init_axes[0]) == 0
        for ax in init_axes[1:]:
            first = jnp.logical_and(first, pl.program_id(ax) == 0)

        @pl.when(first)
        def _():
            sum_ref[...] = jnp.zeros_like(sum_ref)
            sq_ref[...] = jnp.zeros_like(sq_ref)

        c_t = sum_ref.shape[0]
        if tail > 0:
            lane = jax.lax.broadcasted_iota(jnp.int32, (c_t, chunk_w), 1)
            keep = lane >= (chunk_w - tail)

        def row_body(b, carry):
            s, q = carry
            xrow = x_ref.at[b]                       # (c_tile, tile_m) view, dynamic row
            for j in range(n_full):                  # bounded static unroll
                xj = xrow[:, j * chunk_w:(j + 1) * chunk_w].astype(jnp.float32)
                s = s + xj
                q = q + xj * xj
            if tail > 0:
                # Overlapping 128-wide window covers the non-128-multiple tail;
                # lanes already counted by the last full chunk are masked out.
                xt = xrow[:, tile_m - chunk_w:tile_m].astype(jnp.float32)
                xt = jnp.where(keep, xt, 0.0)
                s = s + xt
                q = q + xt * xt
            return s, q

        s, q = jax.lax.fori_loop(0, nb, row_body, (sum_ref[...], sq_ref[...]))
        sum_ref[...] = s
        sq_ref[...] = q

    return kernel


def _make_normalize_kernel(nb, n_full, chunk_w, tail, tile_m):
    """y = x * scale[c] + shift[c], f32 math, output in the input dtype."""

    def kernel(x_ref, scale_ref, shift_ref, y_ref):
        scale = scale_ref[...]          # (c_tile, 1) f32, broadcasts over lanes
        shift = shift_ref[...]

        def row_body(b, carry):
            xrow = x_ref.at[b]
            yrow = y_ref.at[b]
            for j in range(n_full):
                sl = slice(j * chunk_w, (j + 1) * chunk_w)
                xj = xrow[:, sl].astype(jnp.float32)
                yrow[:, sl] = (xj * scale + shift).astype(y_ref.dtype)
            if tail > 0:
                sl = slice(n_full * chunk_w, tile_m)
                xt = xrow[:, sl].astype(jnp.float32)
                yrow[:, sl] = (xt * scale + shift).astype(y_ref.dtype)
            return carry

        jax.lax.fori_loop(0, nb, row_body, 0)

    return kernel


def _make_fused_kernel(n, m, n_full, chunk_w, tail, eps):
    """Stats + normalize on a VMEM-resident (N, c_tile, M) slab (x read from HBM once)."""
    inv_count = 1.0 / float(n * m)

    def kernel(x_ref, w_ref, b_ref, y_ref, mean_ref, var_ref):
        c_t = x_ref.shape[1]
        if tail > 0:
            lane = jax.lax.broadcasted_iota(jnp.int32, (c_t, chunk_w), 1)
            keep = lane >= (chunk_w - tail)

        # Pass 1: per-channel sum / sum of squares (register accumulators).
        def acc_row(b, carry):
            s, q = carry
            xrow = x_ref.at[b]
            for j in range(n_full):
                xj = xrow[:, j * chunk_w:(j + 1) * chunk_w].astype(jnp.float32)
                s = s + xj
                q = q + xj * xj
            if tail > 0:
                xt = xrow[:, m - chunk_w:m].astype(jnp.float32)
                xt = jnp.where(keep, xt, 0.0)
                s = s + xt
                q = q + xt * xt
            return s, q

        zeros = jnp.zeros((c_t, chunk_w), jnp.float32)
        s, q = jax.lax.fori_loop(0, n, acc_row, (zeros, zeros))

        mean = jnp.sum(s, axis=1, keepdims=True) * inv_count   # (c_t, 1)
        ex2 = jnp.sum(q, axis=1, keepdims=True) * inv_count
        # Biased variance (matches torch var(unbiased=False) / the module's lerp).
        # TODO(synk): switch to a centered / Welford combine if E[x^2]-E[x]^2
        # cancellation ever matters for channels with mean >> std.
        var = jnp.maximum(ex2 - mean * mean, 0.0)
        scale = w_ref[...] * jax.lax.rsqrt(var + eps)
        shift = b_ref[...] - mean * scale
        mean_ref[...] = mean
        var_ref[...] = var

        # Pass 2: normalize (x is VMEM-resident, so the re-read is cheap).
        def norm_row(b, carry):
            xrow = x_ref.at[b]
            yrow = y_ref.at[b]
            for j in range(n_full):
                sl = slice(j * chunk_w, (j + 1) * chunk_w)
                xj = xrow[:, sl].astype(jnp.float32)
                yrow[:, sl] = (xj * scale + shift).astype(y_ref.dtype)
            if tail > 0:
                sl = slice(n_full * chunk_w, m)
                xt = xrow[:, sl].astype(jnp.float32)
                yrow[:, sl] = (xt * scale + shift).astype(y_ref.dtype)
            return carry

        jax.lax.fori_loop(0, n, norm_row, 0)

    return kernel


# ---------------------------------------------------------------------------
# pallas_call wrappers
# ---------------------------------------------------------------------------
def _stats_call(x3):
    """Per-channel (E[x], E[x^2]) of an (N, C, M) tensor, reducing over N and M."""
    n, c, m = x3.shape
    nb, c_tile, tile_m = _plan_tiles(n, c, m, x3.dtype.itemsize)
    chunk_w, n_full, tail = _chunk_plan(tile_m)
    nbg, cg, mg = n // nb, c // c_tile, m // tile_m

    if cg >= 2:
        # Megacore over channel tiles; one resident accumulator per channel tile.
        kernel = _make_stats_kernel(nb, n_full, chunk_w, tail, tile_m, init_axes=(1, 2))
        grid = (cg, nbg, mg)
        in_specs = [pl.BlockSpec((nb, c_tile, tile_m), lambda ci, i, j: (i, ci, j))]
        out_shape = (jax.ShapeDtypeStruct((c, chunk_w), jnp.float32),) * 2
        out_specs = (pl.BlockSpec((c_tile, chunk_w), lambda ci, i, j: (ci, 0)),) * 2
        semantics = ("parallel", "arbitrary", "arbitrary")
    else:
        # Small channel count: megacore over batch tiles with per-batch-tile
        # partial accumulators (init guard is on the M axis only).
        kernel = _make_stats_kernel(nb, n_full, chunk_w, tail, tile_m, init_axes=(2,))
        grid = (nbg, cg, mg)
        in_specs = [pl.BlockSpec((nb, c_tile, tile_m), lambda i, ci, j: (i, ci, j))]
        out_shape = (jax.ShapeDtypeStruct((nbg, c, chunk_w), jnp.float32),) * 2
        out_specs = (pl.BlockSpec((None, c_tile, chunk_w), lambda i, ci, j: (i, ci, 0)),) * 2
        semantics = ("parallel", "parallel", "arbitrary")

    s, q = pl.pallas_call(
        kernel,
        out_shape=out_shape,
        grid=grid,
        in_specs=in_specs,
        out_specs=out_specs,
        compiler_params=pltpu.CompilerParams(
            dimension_semantics=semantics, vmem_limit_bytes=_VMEM_LIMIT),
    )(x3)

    inv = 1.0 / float(n * m)
    if s.ndim == 3:
        ex, ex2 = s.sum(axis=(0, 2)) * inv, q.sum(axis=(0, 2)) * inv
    else:
        ex, ex2 = s.sum(axis=1) * inv, q.sum(axis=1) * inv
    return ex, ex2


def _normalize_call(x3, scale, shift):
    """y = x * scale[c] + shift[c]; output in the input dtype; fully parallel grid."""
    n, c, m = x3.shape
    nb, c_tile, tile_m = _plan_tiles(n, c, m, x3.dtype.itemsize)
    chunk_w, n_full, tail = _chunk_plan(tile_m)
    kernel = _make_normalize_kernel(nb, n_full, chunk_w, tail, tile_m)
    y3 = pl.pallas_call(
        kernel,
        out_shape=jax.ShapeDtypeStruct((n, c, m), x3.dtype),
        grid=(n // nb, c // c_tile, m // tile_m),
        in_specs=[pl.BlockSpec((nb, c_tile, tile_m), lambda i, ci, j: (i, ci, j)),
                  pl.BlockSpec((c_tile, 1), lambda i, ci, j: (ci, 0)),
                  pl.BlockSpec((c_tile, 1), lambda i, ci, j: (ci, 0))],
        out_specs=pl.BlockSpec((nb, c_tile, tile_m), lambda i, ci, j: (i, ci, j)),
        compiler_params=pltpu.CompilerParams(
            dimension_semantics=("parallel", "parallel", "parallel"),
            vmem_limit_bytes=_VMEM_LIMIT),
    )(x3,
      scale.reshape(c, 1).astype(jnp.float32),
      shift.reshape(c, 1).astype(jnp.float32))
    return y3


def _fused_call(x3, weight, bias, eps, c_tilef):
    """Single-read fused stats + normalize; grid over channel tiles (megacore)."""
    n, c, m = x3.shape
    chunk_w, n_full, tail = _chunk_plan(m)
    kernel = _make_fused_kernel(n, m, n_full, chunk_w, tail, eps)
    y3, mean, var = pl.pallas_call(
        kernel,
        out_shape=(jax.ShapeDtypeStruct((n, c, m), x3.dtype),
                   jax.ShapeDtypeStruct((c, 1), jnp.float32),
                   jax.ShapeDtypeStruct((c, 1), jnp.float32)),
        grid=(c // c_tilef,),
        in_specs=[pl.BlockSpec((n, c_tilef, m), lambda ci: (0, ci, 0)),
                  pl.BlockSpec((c_tilef, 1), lambda ci: (ci, 0)),
                  pl.BlockSpec((c_tilef, 1), lambda ci: (ci, 0))],
        out_specs=(pl.BlockSpec((n, c_tilef, m), lambda ci: (0, ci, 0)),
                   pl.BlockSpec((c_tilef, 1), lambda ci: (ci, 0)),
                   pl.BlockSpec((c_tilef, 1), lambda ci: (ci, 0))),
        compiler_params=pltpu.CompilerParams(
            dimension_semantics=("parallel",),
            vmem_limit_bytes=_VMEM_LIMIT),
    )(x3,
      weight.reshape(c, 1).astype(jnp.float32),
      bias.reshape(c, 1).astype(jnp.float32))
    return y3, mean.reshape(c), var.reshape(c)


# ---------------------------------------------------------------------------
# jitted front-ends
# ---------------------------------------------------------------------------
def _scale_shift(mean, var, weight, bias, eps):
    scale = weight.astype(jnp.float32) * jax.lax.rsqrt(var.astype(jnp.float32) + eps)
    shift = bias.astype(jnp.float32) - mean.astype(jnp.float32) * scale
    return scale, shift


def _train_twopass_impl(x3, w, b, eps):
    ex, ex2 = _stats_call(x3)
    mean = ex
    var = jnp.maximum(ex2 - ex * ex, 0.0)  # biased var (unbiased=False), f32 accumulation
    scale, shift = _scale_shift(mean, var, w, b, eps)
    y3 = _normalize_call(x3, scale, shift)
    return y3, mean, var


@functools.partial(jax.jit, static_argnames=("eps",))
def _bn_train(x, w, b, eps):
    """Training forward: fused single-read path when it fits VMEM, else two-pass."""
    n, c, h, wd = x.shape
    m = h * wd
    x3 = x.reshape(n, c, m)
    c_tilef = _fused_c_tile(n, c, m, x.dtype.itemsize)
    if c_tilef is not None:
        y3, mean, var = _fused_call(x3, w, b, eps, c_tilef)
    else:
        y3, mean, var = _train_twopass_impl(x3, w, b, eps)
    return y3.reshape(x.shape), mean, var


@functools.partial(jax.jit, static_argnames=("eps",))
def _bn_train_twopass(x, w, b, eps):
    """Streaming two-pass training forward (kept callable directly for testing)."""
    n, c, h, wd = x.shape
    x3 = x.reshape(n, c, h * wd)
    y3, mean, var = _train_twopass_impl(x3, w, b, eps)
    return y3.reshape(x.shape), mean, var


@jax.jit
def _bn_stats(x):
    n, c, h, wd = x.shape
    return _stats_call(x.reshape(n, c, h * wd))


@functools.partial(jax.jit, static_argnames=("eps",))
def _bn_normalize(x, mean, var, weight, bias, eps):
    n, c, h, wd = x.shape
    scale, shift = _scale_shift(mean, var, weight, bias, eps)
    y3 = _normalize_call(x.reshape(n, c, h * wd), scale, shift)
    return y3.reshape(x.shape)


# ---------------------------------------------------------------------------
# Module
# ---------------------------------------------------------------------------
class VariableLengthBatchNorm2D:
    """JAX/Pallas re-implementation of the PyTorch module's forward pass."""

    def __init__(self, num_features, eps=1e-5, momentum=0.1, affine=True,
                 track_running_stats=True):
        self.num_features = num_features
        self.eps = float(eps)
        self.momentum = momentum
        self.affine = affine
        self.track_running_stats = track_running_stats
        self.training = True
        # Deterministic init, mirroring reset_parameters(): weight=1, bias=0.
        if affine:
            self.weight = jnp.ones((num_features,), jnp.float32)
            self.bias = jnp.zeros((num_features,), jnp.float32)
        else:
            self.weight = None
            self.bias = None
        if track_running_stats:
            self.running_mean = jnp.zeros((num_features,), jnp.float32)
            self.running_var = jnp.ones((num_features,), jnp.float32)
            self.num_batches_tracked = 0
        else:
            self.running_mean = None
            self.running_var = None
            self.num_batches_tracked = None

    def __call__(self, x):
        variable_length = isinstance(x, (list, tuple))

        exponential_average_factor = 0.0
        if self.training and self.track_running_stats:
            self.num_batches_tracked += 1
            if self.momentum is None:
                exponential_average_factor = 1.0 / self.num_batches_tracked
            else:
                exponential_average_factor = self.momentum

        training = self.training or not self.track_running_stats

        c = self.num_features
        w = self.weight if self.affine else jnp.ones((c,), jnp.float32)
        b = self.bias if self.affine else jnp.zeros((c,), jnp.float32)

        y = None
        if training:
            if variable_length:
                # TODO(synk): concatenate list elements into one lane-packed
                # stats/normalize launch (PrefetchScalarGridSpec with per-element
                # offsets) to amortize per-element dispatch overhead.
                stats = []
                for x_ in x:
                    if x_.shape[0] != 1:
                        raise ValueError(
                            "The first dimension (batch) of each element of x "
                            "must be `1`.")
                    stats.append(_bn_stats(x_))  # fused sum/sumsq, one read per element
                l = len(x)
                mean = sum(ex for ex, _ in stats) / l
                # (1/L) * sum_i E_i[(x - mean)^2], matching the torch reference.
                var = sum(ex2 - 2.0 * mean * ex for ex, ex2 in stats) / l + mean * mean
                var = jnp.maximum(var, 0.0)
            else:
                y, mean, var = _bn_train(x, w, b, self.eps)
            if self.track_running_stats:
                f = exponential_average_factor
                self.running_mean = self.running_mean + f * (mean - self.running_mean)
                self.running_var = self.running_var + f * (var - self.running_var)
        else:
            mean = self.running_mean
            var = self.running_var

        if variable_length:
            return [_bn_normalize(x_, mean, var, w, b, self.eps) for x_ in x]
        if y is not None:  # training single-tensor path already normalized
            return y
        return _bn_normalize(x, mean, var, w, b, self.eps)


# ---------------------------------------------------------------------------
# Reference (pure JAX) for silent verification
# ---------------------------------------------------------------------------
def _ref_bn(x, mean, var, w, b, eps):
    xf = x.astype(jnp.float32)
    m = mean[None, :, None, None]
    v = var[None, :, None, None]
    return (xf - m) * (w[None, :, None, None] / jnp.sqrt(v + eps)) + b[None, :, None, None]


def _check_train(fn, x, w, b, eps, atol_y=2e-4, atol_s=1e-4):
    y, mean, var = jax.block_until_ready(fn(x, w, b, eps))
    xf = x.astype(jnp.float32)
    rm = xf.mean(axis=(0, 2, 3))
    rv = ((xf - rm[None, :, None, None]) ** 2).mean(axis=(0, 2, 3))
    ry = _ref_bn(x, rm, rv, w, b, eps)
    assert y.dtype == x.dtype
    assert jnp.allclose(mean, rm, atol=atol_s, rtol=1e-4)
    assert jnp.allclose(var, rv, atol=atol_s, rtol=1e-4)
    assert jnp.allclose(y, ry, atol=atol_y, rtol=1e-4)


if __name__ == "__main__":
    key = jax.random.PRNGKey(0)
    k1, k2, k3, k4, k5, k6 = jax.random.split(key, 6)

    C = 4
    bn = VariableLengthBatchNorm2D(C)
    w1 = jnp.ones((C,), jnp.float32)
    b0 = jnp.zeros((C,), jnp.float32)

    # --- single-tensor (training) path: fused kernel ------------------------
    x = jax.random.normal(k1, (2, C, 16, 16), jnp.float32)
    y = jax.block_until_ready(bn(x))
    assert y.dtype == x.dtype

    xf = x.astype(jnp.float32)
    ref_mean = xf.mean(axis=(0, 2, 3))
    ref_var = ((xf - ref_mean[None, :, None, None]) ** 2).mean(axis=(0, 2, 3))
    ref_y = _ref_bn(x, ref_mean, ref_var, bn.weight, bn.bias, bn.eps)
    assert jnp.allclose(y, ref_y, atol=1e-4, rtol=1e-5)
    assert jnp.allclose(bn.running_mean, 0.1 * ref_mean, atol=1e-5)
    assert jnp.allclose(bn.running_var, 0.9 + 0.1 * ref_var, atol=1e-5)

    # --- streaming two-pass path (exercised explicitly) ----------------------
    _check_train(_bn_train_twopass, x, w1, b0, 1e-5)

    # --- non-128-multiple spatial sizes (tail / M<128 code paths) ------------
    x_tail = jax.random.normal(k4, (2, C, 10, 15), jnp.float32)   # M = 150 (tail = 22)
    _check_train(_bn_train, x_tail, w1, b0, 1e-5)
    _check_train(_bn_train_twopass, x_tail, w1, b0, 1e-5)
    x_small = jax.random.normal(k4, (2, C, 5, 5), jnp.float32)    # M = 25 (< 128)
    _check_train(_bn_train, x_small, w1, b0, 1e-5)

    # --- larger channel count (multi channel-tile fused grid) ----------------
    C2 = 128
    x_big = jax.random.normal(k5, (2, C2, 16, 16), jnp.float32)
    _check_train(_bn_train, x_big, jnp.ones((C2,), jnp.float32),
                 jnp.zeros((C2,), jnp.float32), 1e-5)

    # --- bf16 training via the fused kernel (dtype-preserving output) --------
    yb16, mb16, vb16 = jax.block_until_ready(
        _bn_train(x.astype(jnp.bfloat16), w1, b0, 1e-5))
    assert yb16.dtype == jnp.bfloat16
    assert jnp.allclose(yb16.astype(jnp.float32), ref_y, atol=5e-2, rtol=5e-2)

    # --- multi-block streaming path (per-batch-tile partials & case-A grid) --
    _saved_target = _TARGET_BLOCK_BYTES
    _TARGET_BLOCK_BYTES = 4096  # shrink blocks so small shapes use multi-step grids
    try:
        x_mb = jax.random.normal(k6, (4, C, 8, 128), jnp.float32)       # case B, nbg=2, mg=4
        _check_train(_bn_train_twopass, x_mb, w1, b0, 1e-5)
        x_ma = jax.random.normal(k6, (3, C2, 16, 16), jnp.float32)      # case A, grid (2,3,2)
        _check_train(_bn_train_twopass, x_ma, jnp.ones((C2,), jnp.float32),
                     jnp.zeros((C2,), jnp.float32), 1e-5)
    finally:
        _TARGET_BLOCK_BYTES = _saved_target

    # --- variable-length list (training) path --------------------------------
    xs = [jax.random.normal(k2, (1, C, 16, 16), jnp.float32),
          jax.random.normal(k3, (1, C, 8, 16), jnp.float32)]
    ys = jax.block_until_ready(bn(xs))
    vl_mean = sum(x_.mean(axis=(0, 2, 3)) for x_ in xs) / len(xs)
    vl_var = sum(((x_ - vl_mean[None, :, None, None]) ** 2).mean(axis=(0, 2, 3))
                 for x_ in xs) / len(xs)
    for x_, y_ in zip(xs, ys):
        ref = _ref_bn(x_, vl_mean, vl_var, bn.weight, bn.bias, bn.eps)
        assert jnp.allclose(y_, ref, atol=1e-4, rtol=1e-5)

    # --- eval path (uses running stats) --------------------------------------
    bn.training = False
    y_eval = jax.block_until_ready(bn(x))
    ref_eval = _ref_bn(x, bn.running_mean, bn.running_var, bn.weight, bn.bias, bn.eps)
    assert jnp.allclose(y_eval, ref_eval, atol=1e-4, rtol=1e-5)

    # --- dtype preservation on the eval/normalize path ------------------------
    yb = jax.block_until_ready(bn(x.astype(jnp.bfloat16)))
    assert yb.dtype == jnp.bfloat16

    print("KERNEL_OK")
</pallas_src>

<mosaic_0001>
module attributes {stable_mosaic.version = 11 : i64} {
  func.func @kernel(%arg0: i32, %arg1: memref<2x4x256xf32, #tpu.memory_space<vmem>>, %arg2: memref<4x1xf32, #tpu.memory_space<vmem>>, %arg3: memref<4x1xf32, #tpu.memory_space<vmem>>, %arg4: memref<2x4x256xf32, #tpu.memory_space<vmem>>, %arg5: memref<4x1xf32, #tpu.memory_space<vmem>>, %arg6: memref<4x1xf32, #tpu.memory_space<vmem>>) attributes {dimension_semantics = [#tpu.dimension_semantics<parallel>], iteration_bounds = array<i64: 1>, scalar_prefetch = 0 : i64, scratch_operands = 0 : i64, tpu.core_type = #tpu.core_type<tc>, window_params = [{transform_indices = @transform_0, window_bounds = array<i64: 2, 4, 256>}, {transform_indices = @transform_1, window_bounds = array<i64: 4, 1>}, {transform_indices = @transform_2, window_bounds = array<i64: 4, 1>}, {transform_indices = @transform_3, window_bounds = array<i64: 2, 4, 256>}, {transform_indices = @transform_4, window_bounds = array<i64: 4, 1>}, {transform_indices = @transform_5, window_bounds = array<i64: 4, 1>}]} {
    %cst = arith.constant 0.000000e+00 : f32
    %0 = vector.broadcast %cst : f32 to vector<4x128xf32>
    %c0_i32 = arith.constant 0 : i32
    %c2_i32 = arith.constant 2 : i32
    %1 = arith.addi %c0_i32, %c2_i32 : i32
    %c1_i32 = arith.constant 1 : i32
    %2:2 = scf.for %arg7 = %c0_i32 to %1 step %c1_i32 iter_args(%arg8 = %0, %arg9 = %0) -> (vector<4x128xf32>, vector<4x128xf32>)  : i32 {
      %c0_i32_18 = arith.constant 0 : i32
      %c0_i32_19 = arith.constant 0 : i32
      %26 = tpu.memref_slice %arg1[%arg7, %c0_i32_18, %c0_i32_19] : memref<2x4x256xf32, #tpu.memory_space<vmem>> -> memref<1x4x256xf32, #tpu.memory_space<vmem>>
      %27 = tpu.memref_squeeze %26 : memref<1x4x256xf32, #tpu.memory_space<vmem>> -> memref<4x256xf32, #tpu.memory_space<vmem>>
      %c0_20 = arith.constant 0 : index
      %c0_21 = arith.constant 0 : index
      %28 = vector.load %27[%c0_20, %c0_21] : memref<4x256xf32, #tpu.memory_space<vmem>>, vector<4x128xf32>
      %29 = arith.addf %arg8, %28 : vector<4x128xf32>
      %30 = arith.mulf %28, %28 : vector<4x128xf32>
      %31 = arith.addf %arg9, %30 : vector<4x128xf32>
      %c0_i32_22 = arith.constant 0 : i32
      %c0_i32_23 = arith.constant 0 : i32
      %32 = tpu.memref_slice %arg1[%arg7, %c0_i32_22, %c0_i32_23] : memref<2x4x256xf32, #tpu.memory_space<vmem>> -> memref<1x4x256xf32, #tpu.memory_space<vmem>>
      %33 = tpu.memref_squeeze %32 : memref<1x4x256xf32, #tpu.memory_space<vmem>> -> memref<4x256xf32, #tpu.memory_space<vmem>>
      %c0_24 = arith.constant 0 : index
      %c128 = arith.constant 128 : index
      %34 = vector.load %33[%c0_24, %c128] : memref<4x256xf32, #tpu.memory_space<vmem>>, vector<4x128xf32>
      %35 = arith.addf %29, %34 : vector<4x128xf32>
      %36 = arith.mulf %34, %34 : vector<4x128xf32>
      %37 = arith.addf %31, %36 : vector<4x128xf32>
      scf.yield %35, %37 : vector<4x128xf32>, vector<4x128xf32>
    }
    %c2_i32_0 = arith.constant 2 : i32
    %cst_1 = arith.constant dense<0.000000e+00> : vector<4xf32>
    %3 = vector.multi_reduction <add>, %2#0, %cst_1 [1] : vector<4x128xf32> to vector<4xf32>
    %4 = vector.shape_cast %3 : vector<4xf32> to vector<4x1xf32>
    %cst_2 = arith.constant 0.001953125 : f32
    %5 = vector.broadcast %cst_2 : f32 to vector<4x1xf32>
    %6 = arith.mulf %4, %5 : vector<4x1xf32>
    %cst_3 = arith.constant dense<0.000000e+00> : vector<4xf32>
    %7 = vector.multi_reduction <add>, %2#1, %cst_3 [1] : vector<4x128xf32> to vector<4xf32>
    %8 = vector.shape_cast %7 : vector<4xf32> to vector<4x1xf32>
    %cst_4 = arith.constant 0.001953125 : f32
    %9 = vector.broadcast %cst_4 : f32 to vector<4x1xf32>
    %10 = arith.mulf %8, %9 : vector<4x1xf32>
    %11 = arith.mulf %6, %6 : vector<4x1xf32>
    %12 = arith.subf %10, %11 : vector<4x1xf32>
    %cst_5 = arith.constant 0.000000e+00 : f32
    %13 = vector.broadcast %cst_5 : f32 to vector<4x1xf32>
    %14 = arith.maximumf %12, %13 : vector<4x1xf32>
    %c0 = arith.constant 0 : index
    %c0_6 = arith.constant 0 : index
    %15 = vector.load %arg2[%c0, %c0_6] : memref<4x1xf32, #tpu.memory_space<vmem>>, vector<4x1xf32>
    %cst_7 = arith.constant 9.99999974E-6 : f32
    %16 = vector.broadcast %cst_7 : f32 to vector<4x1xf32>
    %17 = arith.addf %14, %16 : vector<4x1xf32>
    %18 = math.rsqrt %17 : vector<4x1xf32>
    %19 = arith.mulf %15, %18 : vector<4x1xf32>
    %c0_8 = arith.constant 0 : index
    %c0_9 = arith.constant 0 : index
    %20 = vector.load %arg3[%c0_8, %c0_9] : memref<4x1xf32, #tpu.memory_space<vmem>>, vector<4x1xf32>
    %21 = arith.mulf %6, %19 : vector<4x1xf32>
    %22 = arith.subf %20, %21 : vector<4x1xf32>
    %c0_10 = arith.constant 0 : index
    %c0_11 = arith.constant 0 : index
    %23 = vector.load %arg5[%c0_10, %c0_11] : memref<4x1xf32, #tpu.memory_space<vmem>>, vector<4x1xf32>
    tpu.vector_store %arg5[%c0_10, %c0_11], %6 {strides = array<i32>} : memref<4x1xf32, #tpu.memory_space<vmem>>, vector<4x1xf32>,
    %c0_12 = arith.constant 0 : index
    %c0_13 = arith.constant 0 : index
    %24 = vector.load %arg6[%c0_12, %c0_13] : memref<4x1xf32, #tpu.memory_space<vmem>>, vector<4x1xf32>
    tpu.vector_store %arg6[%c0_12, %c0_13], %14 {strides = array<i32>} : memref<4x1xf32, #tpu.memory_space<vmem>>, vector<4x1xf32>,
    %c0_i32_14 = arith.constant 0 : i32
    %c2_i32_15 = arith.constant 2 : i32
    %25 = arith.addi %c0_i32_14, %c2_i32_15 : i32
    %c1_i32_16 = arith.constant 1 : i32
    scf.for %arg7 = %c0_i32_14 to %25 step %c1_i32_16  : i32 {
      %c0_i32_18 = arith.constant 0 : i32
      %c0_i32_19 = arith.constant 0 : i32
      %26 = tpu.memref_slice %arg1[%arg7, %c0_i32_18, %c0_i32_19] : memref<2x4x256xf32, #tpu.memory_space<vmem>> -> memref<1x4x256xf32, #tpu.memory_space<vmem>>
      %27 = tpu.memref_squeeze %26 : memref<1x4x256xf32, #tpu.memory_space<vmem>> -> memref<4x256xf32, #tpu.memory_space<vmem>>
      %c0_20 = arith.constant 0 : index
      %c0_21 = arith.constant 0 : index
      %28 = vector.load %27[%c0_20, %c0_21] : memref<4x256xf32, #tpu.memory_space<vmem>>, vector<4x128xf32>
      %29 = vector.broadcast %19 : vector<4x1xf32> to vector<4x128xf32>
      %30 = arith.mulf %28, %29 : vector<4x128xf32>
      %31 = vector.broadcast %22 : vector<4x1xf32> to vector<4x128xf32>
      %32 = arith.addf %30, %31 : vector<4x128xf32>
      %c0_i32_22 = arith.constant 0 : i32
      %c0_i32_23 = arith.constant 0 : i32
      %33 = tpu.memref_slice %arg4[%arg7, %c0_i32_22, %c0_i32_23] : memref<2x4x256xf32, #tpu.memory_space<vmem>> -> memref<1x4x256xf32, #tpu.memory_space<vmem>>
      %34 = tpu.memref_squeeze %33 : memref<1x4x256xf32, #tpu.memory_space<vmem>> -> memref<4x256xf32, #tpu.memory_space<vmem>>
      %c0_24 = arith.constant 0 : index
      %c0_25 = arith.constant 0 : index
      %35 = vector.load %34[%c0_24, %c0_25] : memref<4x256xf32, #tpu.memory_space<vmem>>, vector<4x128xf32>
      tpu.vector_store %34[%c0_24, %c0_25], %32 {strides = array<i32>} : memref<4x256xf32, #tpu.memory_space<vmem>>, vector<4x128xf32>,
      %c0_i32_26 = arith.constant 0 : i32
      %c0_i32_27 = arith.constant 0 : i32
      %36 = tpu.memref_slice %arg1[%arg7, %c0_i32_26, %c0_i32_27] : memref<2x4x256xf32, #tpu.memory_space<vmem>> -> memref<1x4x256xf32, #tpu.memory_space<vmem>>
      %37 = tpu.memref_squeeze %36 : memref<1x4x256xf32, #tpu.memory_space<vmem>> -> memref<4x256xf32, #tpu.memory_space<vmem>>
      %c0_28 = arith.constant 0 : index
      %c128 = arith.constant 128 : index
      %38 = vector.load %37[%c0_28, %c128] : memref<4x256xf32, #tpu.memory_space<vmem>>, vector<4x128xf32>
      %39 = vector.broadcast %19 : vector<4x1xf32> to vector<4x128xf32>
      %40 = arith.mulf %38, %39 : vector<4x128xf32>
      %41 = vector.broadcast %22 : vector<4x1xf32> to vector<4x128xf32>
      %42 = arith.addf %40, %41 : vector<4x128xf32>
      %c0_i32_29 = arith.constant 0 : i32
      %c0_i32_30 = arith.constant 0 : i32
      %43 = tpu.memref_slice %arg4[%arg7, %c0_i32_29, %c0_i32_30] : memref<2x4x256xf32, #tpu.memory_space<vmem>> -> memref<1x4x256xf32, #tpu.memory_space<vmem>>
      %44 = tpu.memref_squeeze %43 : memref<1x4x256xf32, #tpu.memory_space<vmem>> -> memref<4x256xf32, #tpu.memory_space<vmem>>
      %c0_31 = arith.constant 0 : index
      %c128_32 = arith.constant 128 : index
      %45 = vector.load %44[%c0_31, %c128_32] : memref<4x256xf32, #tpu.memory_space<vmem>>, vector<4x128xf32>
      tpu.vector_store %44[%c0_31, %c128_32], %42 {strides = array<i32>} : memref<4x256xf32, #tpu.memory_space<vmem>>, vector<4x128xf32>,
    }
    %c2_i32_17 = arith.constant 2 : i32
    return
  }
  func.func @transform_0(%arg0: i32) -> (i32, i32, i32) {
    %c0_i32 = arith.constant 0 : i32
    %c0_i32_0 = arith.constant 0 : i32
    %c0_i32_1 = arith.constant 0 : i32
    return %c0_i32, %arg0, %c0_i32_0 : i32, i32, i32
  }
  func.func @transform_1(%arg0: i32) -> (i32, i32) {
    %c0_i32 = arith.constant 0 : i32
    %c0_i32_0 = arith.constant 0 : i32
    return %arg0, %c0_i32 : i32, i32
  }
  func.func @transform_2(%arg0: i32) -> (i32, i32) {
    %c0_i32 = arith.constant 0 : i32
    %c0_i32_0 = arith.constant 0 : i32
    return %arg0, %c0_i32 : i32, i32
  }
  func.func @transform_3(%arg0: i32) -> (i32, i32, i32) {
    %c0_i32 = arith.constant 0 : i32
    %c0_i32_0 = arith.constant 0 : i32
    %c0_i32_1 = arith.constant 0 : i32
    return %c0_i32, %arg0, %c0_i32_0 : i32, i32, i32
  }
  func.func @transform_4(%arg0: i32) -> (i32, i32) {
    %c0_i32 = arith.constant 0 : i32
    %c0_i32_0 = arith.constant 0 : i32
    return %arg0, %c0_i32 : i32, i32
  }
  func.func @transform_5(%arg0: i32) -> (i32, i32) {
    %c0_i32 = arith.constant 0 : i32
    %c0_i32_0 = arith.constant 0 : i32
    return %arg0, %c0_i32 : i32, i32
  }
}

</mosaic_0001>

<bundles_post_ra>
// kernel: _bn_train.1
= control target key start
LH: loop header
LB: loop body
LE: loop exit
PB: predicated region body
PF: predicated region fallthrough
CT: control target
= control target key end

     0   :  { %v181_v0 = vmov 0.0   ;;  %v185_v1 = vmov 0.0   ;;  %s189_s18 = smov 0   ;;  %s249_s0 = inlined_call_operand.vmem [shape: f32[2,4,256], index: 0, kind: input, shape index: {}]   ;;  %s250_s1 = inlined_call_operand.vmem [shape: f32[4,1], index: 1, kind: input, shape index: {}]   ;;  %s251_s2 = inlined_call_operand.vmem [shape: f32[4,1], index: 2, kind: input, shape index: {}]   ;;  %s252_s3 = inlined_call_operand.vmem [shape: f32[2,4,256], index: 3, kind: output, shape index: {0}]   ;;  %s253_s4 = inlined_call_operand.vmem [shape: f32[4,1], index: 4, kind: output, shape index: {1}]   ;;  %s254_s5 = inlined_call_operand.vmem [shape: f32[4,1], index: 5, kind: output, shape index: {2}]  }
   0x1 LB: > { %s126_s19 = sshll.u32 %s191_s18, 3  ;;  %s22_s18 = sadd.s32 1, %s191_s18   ;;  %s191_s18 = sphi %s189_s18, %s22_s18   ;;  %v187_v1 = vphi %v185_v1, %v186_v1   ;;  %v183_v0 = vphi %v181_v0, %v182_v0  }
   0x2   : > { %s27_s22 = scalar_lea.vmem %s249_s0, %s126_s19  ;;  %p19_p0 = scmp.ge.s32.totalorder %s22_s18, 2  }
   0x3   : > { %v28_v2 = vld [vmem:[%s27_s22] sm:$0xf]  ;;  %v32_v3 = vld [vmem:[%s27_s22 + $0x4] sm:$0xf]  ;;  %vm36_vm0 = vcmask (%p19_p0), 1043456   ;;  %vm55_vm1 = vcmask (%p19_p0), 3072  }
   0x4   : > { %v29_v4 = vadd.f32 %v187_v1, %v28_v2  ;;  %v30_v5 = vmul.f32 %v28_v2, %v28_v2  ;;  %v34_v6 = vmul.f32 %v32_v3, %v32_v3  ;;  %v48_v20 = vld [vmem:[%s250_s1] sm:$0xf] (%p19_p0) }
   0x5   :  { %v52_v23 = vld [vmem:[%s251_s2] sm:$0xf] (%p19_p0) }
   0x6   : > { %v31_v7 = vadd.f32 %v183_v0, %v30_v5  ;;  %v33_v8 = vadd.f32 %v32_v3, %v29_v4   ;;  %21 = sbr.rel (!%p19_p0) target bundleno = 1 (0x1), region = 65 }
   0x8   : > { %v35_v9 = vadd.f32 %v34_v6, %v31_v7   ;;  %v186_v1 = vmov %v33_v8   ;;  %v37_v10 = vsel (%p19_p0), %vm36_vm0, %v33_v8, 0.0 }
   0x9   :  { %38 = vadd.xlane.f32.xlu0 (%p19_p0), %v37_v10 }
   0xa   : > { %v182_v0 = vmov %v35_v9   ;;  %v41_v11 = vsel (%p19_p0), %vm36_vm0, %v35_v9, 0.0 }
   0xd   :  { %42 = vadd.xlane.f32.xlu0 %v41_v11 }
  0x92   :  { %v39_v12 = vpop.xlane.xlu0 %38 }
  0x93   :  { %v40_v13 = vmul.f32 0.001953125, %v39_v12 }
  0x95   :  { %56 = vst.msk [vmem:[%s253_s4] sm:$0xf] %vm55_vm1, %v40_v13  ;;  %v45_v15 = vmul.f32 %v40_v13, %v40_v13  ;;  %s193_s4 = smov 0  }
  0x96   :  { %v43_v14 = vpop.xlane.xlu0 %42 }
  0x97   :  { %v44_v16 = vmul.f32 0.001953125, %v43_v14 }
  0x99   :  { %v46_v17 = vsub.f32 %v44_v16, %v45_v15 }
  0x9b   :  { %v47_v18 = vmax.f32 %v46_v17, 0.0 }
  0x9d   :  { %v49_v19 = vadd.f32 1e-05, %v47_v18  ;;  %57 = vst.msk [vmem:[%s254_s5] sm:$0xf] %vm55_vm1, %v47_v18 }
  0x9f   :  { %162 = vrsqrt.f32 %v49_v19 }
  0xac   :  { %v163_v21 = vpop.eup %162 }
  0xad   :  { %v51_v22 = vmul.f32 %v163_v21, %v48_v20 }
  0xaf   :  { %v53_v24 = vmul.f32 %v51_v22, %v40_v13 }
  0xb1   :  { %v54_v25 = vsub.f32 %v52_v23, %v53_v24 }
  0xb2 LB: > { %v197_v26 = vmov 0   ;;  %s127_s5 = sshll.u32 %s195_s4, 3  ;;  %s63_s4 = sadd.s32 1, %s195_s4   ;;  %s195_s4 = sphi %s193_s4, %s63_s4  }
  0xb3   : > { %164 = vset.pattern.permute.xlu0 %v197_v26  ;;  %s66_s1 = scalar_lea.vmem %s249_s0, %s127_s5  ;;  %s81_s9 = scalar_lea.vmem %s252_s3, %s127_s5 }
  0xb4   : > { %70 = vperm.xlu0 %164, %v51_v22   ;;  %v67_v28 = vld [vmem:[%s66_s1] sm:$0xf]  ;;  %v83_v29 = vld [vmem:[%s66_s1 + $0x4] sm:$0xf]  ;;  %p60_p1 = scmp.ge.s32.totalorder %s63_s4, 2  }
  0xb8   : > { %76 = vperm.xlu0 %164, %v54_v25  }
 0x12f   : > { %v71_v27 = vpop.permute.xlu0 %70 }
 0x130   : > { %v73_v30 = vmul.f32 %v71_v27, %v67_v28  ;;  %v84_v31 = vmul.f32 %v83_v29, %v71_v27 }
 0x132   :  { %62 = sbr.rel (!%p60_p1) target bundleno = 178 (0xb2), region = 76 }
 0x133   : > { %v77_v32 = vpop.permute.xlu0 %76 }
 0x134   : > { %v79_v33 = vadd.f32 %v77_v32, %v73_v30  ;;  %v85_v34 = vadd.f32 %v84_v31, %v77_v32 }
 0x136   : > { %82 = vst [vmem:[%s81_s9] sm:$0xf] %v79_v33  ;;  %86 = vst [vmem:[%s81_s9 + $0x4] sm:$0xf] %v85_v34 }

</bundles_post_ra>
